<compile_context>
chip_gen: v6e
topology: v6e:2x2x1
jax: 0.10.0
libtpu: 0.0.40
codegen_flags: <defaults>
</compile_context>

<pallas_src>
import jax
import jax.numpy as jnp
from jax import lax
from jax.experimental import pallas as pl
from jax.experimental.pallas import tpu as pltpu

IN_F, HID, OUT_F = 3, 20, 6
PAD_HID = 128           # hidden padded to one full lane group (MXU-friendly)
PAD_OUT = 8             # output units padded to one sublane group
LANE = 128
MAX_TILE_B = 2048       # per-step batch tile; <5 MiB double-buffered


def _round_up(n, m):
    return (n + m - 1) // m * m


def _cdiv(n, m):
    return (n + m - 1) // m


def _choose_tiling(batch):
    """Pick (tile_b, b_pad, n_steps) for the batch grid."""
    b_min = _round_up(max(batch, 1), LANE)          # minimal lane-group padding
    # Enough steps to keep tiles <= MAX_TILE_B, and >= 2 steps when the batch
    # permits so the "parallel" axis can shard across 2 TensorCores (v7x);
    # harmless on single-TC v5e/v6e.
    n_steps = max(_cdiv(b_min, MAX_TILE_B), 2 if b_min >= 2 * LANE else 1)
    tile_b = _round_up(_cdiv(b_min, n_steps), LANE)
    b_pad = tile_b * n_steps
    return tile_b, b_pad, n_steps


# --------------------------------------------------------------------------
# Kernel
# --------------------------------------------------------------------------
def bayes_fnn_kernel(x_ref, w1_ref, b1_ref, w2_ref, b2_ref, w3t_ref, b3t_ref,
                     mask_ref, o_ref):
    # layer 1: (TILE_B, 3) @ (3, 128) + tanh   (padded hidden lanes stay 0)
    z = jnp.dot(x_ref[...], w1_ref[...], preferred_element_type=jnp.float32)
    z = jnp.tanh(z + b1_ref[...])
    # layer 2: (TILE_B, 128) @ (128, 128) + tanh
    z = jnp.dot(z, w2_ref[...], preferred_element_type=jnp.float32)
    z = jnp.tanh(z + b2_ref[...])
    # output layer, transposed: (8, 128) contracted with (TILE_B, 128) on the
    # hidden axis -> (8, TILE_B), batch on lanes (lane-dense narrow output).
    o = lax.dot_general(w3t_ref[...], z, (((1,), (1,)), ((), ())),
                        preferred_element_type=jnp.float32)
    o = o + b3t_ref[...]                           # (8, 1) broadcast over lanes
    # cat(z[:, 0:3], abs(z[:, 3:6])): abs only on output rows 3..5.
    o_ref[...] = jnp.where(mask_ref[...] != 0.0, jnp.abs(o), o)


# --------------------------------------------------------------------------
# Wrapper
# --------------------------------------------------------------------------
def pad_params(params):
    """Zero-pad the sampled weights/biases once into kernel layouts and build
    the constant abs-row mask (output layer stored transposed)."""
    f32 = jnp.float32
    w1p = jnp.zeros((IN_F, PAD_HID), f32).at[:, :HID].set(params["w1"].astype(f32))
    b1p = jnp.zeros((1, PAD_HID), f32).at[:, :HID].set(params["b1"].astype(f32))
    w2p = jnp.zeros((PAD_HID, PAD_HID), f32).at[:HID, :HID].set(params["w2"].astype(f32))
    b2p = jnp.zeros((1, PAD_HID), f32).at[:, :HID].set(params["b2"].astype(f32))
    # transposed output layer: rows = output units (6 -> 8), cols = hidden (20 -> 128)
    w3tp = jnp.zeros((PAD_OUT, PAD_HID), f32).at[:OUT_F, :HID].set(
        params["w3"].T.astype(f32))
    b3tp = jnp.zeros((PAD_OUT, 1), f32).at[:OUT_F, 0].set(
        params["b3"].reshape(-1).astype(f32))
    maskp = jnp.zeros((PAD_OUT, 1), f32).at[3:OUT_F, :].set(1.0)  # abs rows 3..5
    return dict(w1=w1p, b1=b1p, w2=w2p, b2=b2p, w3t=w3tp, b3t=b3tp, mask=maskp)


@jax.jit
def bayesian_net_forward(x, padded_params):
    """x: (B, 3). padded_params: output of pad_params. Returns (B, 6) f32."""
    B = x.shape[0]
    tile_b, b_pad, n_steps = _choose_tiling(B)

    x = x.astype(jnp.float32)
    if b_pad != B:
        # row padding only (3 lanes wide); no materialized lane-padded x.
        x = jnp.pad(x, ((0, b_pad - B), (0, 0)))

    p = padded_params
    resident = lambda i: (0, 0)     # weights/biases/mask: DMA'd once, VMEM-resident
    out_t = pl.pallas_call(
        bayes_fnn_kernel,
        out_shape=jax.ShapeDtypeStruct((PAD_OUT, b_pad), jnp.float32),
        grid=(n_steps,),
        in_specs=[
            pl.BlockSpec((tile_b, IN_F), lambda i: (i, 0)),    # x tile, un-padded lanes
            pl.BlockSpec((IN_F, PAD_HID), resident),           # w1 (3, 128)
            pl.BlockSpec((1, PAD_HID), resident),              # b1
            pl.BlockSpec((PAD_HID, PAD_HID), resident),        # w2
            pl.BlockSpec((1, PAD_HID), resident),              # b2
            pl.BlockSpec((PAD_OUT, PAD_HID), resident),        # w3 transposed (8, 128)
            pl.BlockSpec((PAD_OUT, 1), resident),              # b3 transposed (8, 1)
            pl.BlockSpec((PAD_OUT, 1), resident),              # abs row mask (8, 1)
        ],
        out_specs=pl.BlockSpec((PAD_OUT, tile_b), lambda i: (0, i)),
        compiler_params=pltpu.CompilerParams(
            dimension_semantics=("parallel",)),
    )(x, p["w1"], p["b1"], p["w2"], p["b2"], p["w3t"], p["b3t"], p["mask"])

    # lane-dense (8, b_pad) -> real (B, 6)
    return out_t[:OUT_F, :B].T


# --------------------------------------------------------------------------
# torchbnn-style parameter init + reparameterized sampling (plain JAX glue)
# --------------------------------------------------------------------------
def make_bayes_linear_params(key, in_f, out_f, prior_sigma=0.1):
    """Init mu/log_sigma (torchbnn-style) and sample one realization of
    W (transposed to (in_f, out_f)) and b (shape (1, out_f))."""
    k_mu_w, k_mu_b, k_eps_w, k_eps_b = jax.random.split(key, 4)
    bound = 1.0 / jnp.sqrt(jnp.float32(in_f))
    w_mu = jax.random.uniform(k_mu_w, (out_f, in_f), jnp.float32, -bound, bound)
    b_mu = jax.random.uniform(k_mu_b, (out_f,), jnp.float32, -bound, bound)
    log_sigma = jnp.log(jnp.float32(prior_sigma))
    eps_w = jax.random.normal(k_eps_w, (out_f, in_f), jnp.float32)
    eps_b = jax.random.normal(k_eps_b, (out_f,), jnp.float32)
    w = w_mu + jnp.exp(log_sigma) * eps_w          # (out_f, in_f)
    b = b_mu + jnp.exp(log_sigma) * eps_b          # (out_f,)
    return w.T, b.reshape(1, out_f)                # (in_f, out_f), (1, out_f)


def _reference(x, params):
    z = jnp.tanh(x @ params["w1"] + params["b1"])
    z = jnp.tanh(z @ params["w2"] + params["b2"])
    z = z @ params["w3"] + params["b3"]
    return jnp.concatenate([z[:, :3], jnp.abs(z[:, 3:])], axis=-1)


if __name__ == "__main__":
    root = jax.random.PRNGKey(0)
    k_x, k_x2, k1, k2, k3 = jax.random.split(root, 5)

    w1, b1 = make_bayes_linear_params(k1, IN_F, HID)
    w2, b2 = make_bayes_linear_params(k2, HID, HID)
    w3, b3 = make_bayes_linear_params(k3, HID, OUT_F)
    params = dict(w1=w1, b1=b1, w2=w2, b2=b2, w3=w3, b3=b3)
    padded = pad_params(params)

    # small batch (single grid step)
    B = 8
    x = jax.random.normal(k_x, (B, IN_F), jnp.float32)
    out = jax.block_until_ready(bayesian_net_forward(x, padded))
    ref = _reference(x, params)
    assert out.shape == (B, OUT_F)
    assert jnp.allclose(out, ref, atol=1e-5, rtol=1e-5)

    # larger, non-multiple-of-128 batch: exercises row padding and a 2-step
    # parallel batch grid (2 TensorCores on v7x).
    B2 = 600
    x2 = jax.random.normal(k_x2, (B2, IN_F), jnp.float32)
    out2 = jax.block_until_ready(bayesian_net_forward(x2, padded))
    ref2 = _reference(x2, params)
    assert out2.shape == (B2, OUT_F)
    assert jnp.allclose(out2, ref2, atol=1e-5, rtol=1e-5)

    print("KERNEL_OK")
</pallas_src>

<mosaic_0001>
module attributes {stable_mosaic.version = 11 : i64} {
  func.func @bayes_fnn_kernel(%arg0: i32, %arg1: memref<128x3xf32, #tpu.memory_space<vmem>>, %arg2: memref<3x128xf32, #tpu.memory_space<vmem>>, %arg3: memref<1x128xf32, #tpu.memory_space<vmem>>, %arg4: memref<128x128xf32, #tpu.memory_space<vmem>>, %arg5: memref<1x128xf32, #tpu.memory_space<vmem>>, %arg6: memref<8x128xf32, #tpu.memory_space<vmem>>, %arg7: memref<8x1xf32, #tpu.memory_space<vmem>>, %arg8: memref<8x1xf32, #tpu.memory_space<vmem>>, %arg9: memref<8x128xf32, #tpu.memory_space<vmem>>) attributes {dimension_semantics = [#tpu.dimension_semantics<parallel>], iteration_bounds = array<i64: 1>, scalar_prefetch = 0 : i64, scratch_operands = 0 : i64, tpu.core_type = #tpu.core_type<tc>, window_params = [{transform_indices = @transform_0, window_bounds = array<i64: 128, 3>}, {pipeline_mode = #tpu.pipeline_mode<synchronous>, transform_indices = @transform_1, window_bounds = array<i64: 3, 128>}, {pipeline_mode = #tpu.pipeline_mode<synchronous>, transform_indices = @transform_2, window_bounds = array<i64: 1, 128>}, {pipeline_mode = #tpu.pipeline_mode<synchronous>, transform_indices = @transform_3, window_bounds = array<i64: 128, 128>}, {pipeline_mode = #tpu.pipeline_mode<synchronous>, transform_indices = @transform_4, window_bounds = array<i64: 1, 128>}, {pipeline_mode = #tpu.pipeline_mode<synchronous>, transform_indices = @transform_5, window_bounds = array<i64: 8, 128>}, {pipeline_mode = #tpu.pipeline_mode<synchronous>, transform_indices = @transform_6, window_bounds = array<i64: 8, 1>}, {pipeline_mode = #tpu.pipeline_mode<synchronous>, transform_indices = @transform_7, window_bounds = array<i64: 8, 1>}, {transform_indices = @transform_8, window_bounds = array<i64: 8, 128>}]} {
    %c0 = arith.constant 0 : index
    %c0_0 = arith.constant 0 : index
    %0 = vector.load %arg1[%c0, %c0_0] : memref<128x3xf32, #tpu.memory_space<vmem>>, vector<128x3xf32>
    %c0_1 = arith.constant 0 : index
    %c0_2 = arith.constant 0 : index
    %1 = vector.load %arg2[%c0_1, %c0_2] : memref<3x128xf32, #tpu.memory_space<vmem>>, vector<3x128xf32>
    %cst = arith.constant dense<0.000000e+00> : vector<128x128xf32>
    %2 = tpu.matmul %0, %1, %cst {dimension_numbers = #tpu.dot_dimension_numbers<[1], [0], [0], [1], [0, 0, 1, 1], [], []>} : vector<128x3xf32>, vector<3x128xf32>, vector<128x128xf32> -> vector<128x128xf32>
    %c0_3 = arith.constant 0 : index
    %c0_4 = arith.constant 0 : index
    %3 = vector.load %arg3[%c0_3, %c0_4] : memref<1x128xf32, #tpu.memory_space<vmem>>, vector<1x128xf32>
    %4 = vector.broadcast %3 : vector<1x128xf32> to vector<128x128xf32>
    %5 = arith.addf %2, %4 : vector<128x128xf32>
    %6 = math.tanh %5 : vector<128x128xf32>
    %c0_5 = arith.constant 0 : index
    %c0_6 = arith.constant 0 : index
    %7 = vector.load %arg4[%c0_5, %c0_6] : memref<128x128xf32, #tpu.memory_space<vmem>>, vector<128x128xf32>
    %cst_7 = arith.constant dense<0.000000e+00> : vector<128x128xf32>
    %8 = tpu.matmul %6, %7, %cst_7 {dimension_numbers = #tpu.dot_dimension_numbers<[1], [0], [0], [1], [0, 0, 1, 1], [], []>} : vector<128x128xf32>, vector<128x128xf32>, vector<128x128xf32> -> vector<128x128xf32>
    %c0_8 = arith.constant 0 : index
    %c0_9 = arith.constant 0 : index
    %9 = vector.load %arg5[%c0_8, %c0_9] : memref<1x128xf32, #tpu.memory_space<vmem>>, vector<1x128xf32>
    %10 = vector.broadcast %9 : vector<1x128xf32> to vector<128x128xf32>
    %11 = arith.addf %8, %10 : vector<128x128xf32>
    %12 = math.tanh %11 : vector<128x128xf32>
    %c0_10 = arith.constant 0 : index
    %c0_11 = arith.constant 0 : index
    %13 = vector.load %arg6[%c0_10, %c0_11] : memref<8x128xf32, #tpu.memory_space<vmem>>, vector<8x128xf32>
    %cst_12 = arith.constant dense<0.000000e+00> : vector<8x128xf32>
    %14 = tpu.matmul %13, %12, %cst_12 {dimension_numbers = #tpu.dot_dimension_numbers<[1], [1], [0], [0], [0, 0, 1, 0], [], []>} : vector<8x128xf32>, vector<128x128xf32>, vector<8x128xf32> -> vector<8x128xf32>
    %c0_13 = arith.constant 0 : index
    %c0_14 = arith.constant 0 : index
    %15 = vector.load %arg7[%c0_13, %c0_14] : memref<8x1xf32, #tpu.memory_space<vmem>>, vector<8x1xf32>
    %16 = vector.broadcast %15 : vector<8x1xf32> to vector<8x128xf32>
    %17 = arith.addf %14, %16 : vector<8x128xf32>
    %c0_15 = arith.constant 0 : index
    %c0_16 = arith.constant 0 : index
    %18 = vector.load %arg8[%c0_15, %c0_16] : memref<8x1xf32, #tpu.memory_space<vmem>>, vector<8x1xf32>
    %cst_17 = arith.constant 0.000000e+00 : f32
    %19 = vector.broadcast %cst_17 : f32 to vector<8x1xf32>
    %20 = arith.cmpf one, %18, %19 : vector<8x1xf32>
    %21 = math.absf %17 : vector<8x128xf32>
    %22 = vector.shape_cast %20 : vector<8x1xi1> to vector<8x1xi1>
    %23 = vector.broadcast %22 : vector<8x1xi1> to vector<8x128xi1>
    %24 = arith.select %23, %21, %17 : vector<8x128xi1>, vector<8x128xf32>
    %c0_18 = arith.constant 0 : index
    %c0_19 = arith.constant 0 : index
    %25 = vector.load %arg9[%c0_18, %c0_19] : memref<8x128xf32, #tpu.memory_space<vmem>>, vector<8x128xf32>
    tpu.vector_store %arg9[%c0_18, %c0_19], %24 {strides = array<i32>} : memref<8x128xf32, #tpu.memory_space<vmem>>, vector<8x128xf32>,
    return
  }
  func.func @transform_0(%arg0: i32) -> (i32, i32) {
    %c0_i32 = arith.constant 0 : i32
    %c0_i32_0 = arith.constant 0 : i32
    return %arg0, %c0_i32 : i32, i32
  }
  func.func @transform_1(%arg0: i32) -> (i32, i32) {
    %c0_i32 = arith.constant 0 : i32
    %c0_i32_0 = arith.constant 0 : i32
    %c0_i32_1 = arith.constant 0 : i32
    return %c0_i32, %c0_i32_0 : i32, i32
  }
  func.func @transform_2(%arg0: i32) -> (i32, i32) {
    %c0_i32 = arith.constant 0 : i32
    %c0_i32_0 = arith.constant 0 : i32
    %c0_i32_1 = arith.constant 0 : i32
    return %c0_i32, %c0_i32_0 : i32, i32
  }
  func.func @transform_3(%arg0: i32) -> (i32, i32) {
    %c0_i32 = arith.constant 0 : i32
    %c0_i32_0 = arith.constant 0 : i32
    %c0_i32_1 = arith.constant 0 : i32
    return %c0_i32, %c0_i32_0 : i32, i32
  }
  func.func @transform_4(%arg0: i32) -> (i32, i32) {
    %c0_i32 = arith.constant 0 : i32
    %c0_i32_0 = arith.constant 0 : i32
    %c0_i32_1 = arith.constant 0 : i32
    return %c0_i32, %c0_i32_0 : i32, i32
  }
  func.func @transform_5(%arg0: i32) -> (i32, i32) {
    %c0_i32 = arith.constant 0 : i32
    %c0_i32_0 = arith.constant 0 : i32
    %c0_i32_1 = arith.constant 0 : i32
    return %c0_i32, %c0_i32_0 : i32, i32
  }
  func.func @transform_6(%arg0: i32) -> (i32, i32) {
    %c0_i32 = arith.constant 0 : i32
    %c0_i32_0 = arith.constant 0 : i32
    %c0_i32_1 = arith.constant 0 : i32
    return %c0_i32, %c0_i32_0 : i32, i32
  }
  func.func @transform_7(%arg0: i32) -> (i32, i32) {
    %c0_i32 = arith.constant 0 : i32
    %c0_i32_0 = arith.constant 0 : i32
    %c0_i32_1 = arith.constant 0 : i32
    return %c0_i32, %c0_i32_0 : i32, i32
  }
  func.func @transform_8(%arg0: i32) -> (i32, i32) {
    %c0_i32 = arith.constant 0 : i32
    %c0_i32_0 = arith.constant 0 : i32
    return %c0_i32, %arg0 : i32, i32
  }
}

</mosaic_0001>

<bundles_post_ra>
// kernel: bayesian_net_forward.1
= control target key start
LH: loop header
LB: loop body
LE: loop exit
PB: predicated region body
PF: predicated region fallthrough
CT: control target
= control target key end

     0   :  { %vm102_vm0 = vcmask 1042432   ;;  %vm53_vm1 = vcmask 23552   ;;  %vm813_vm2 = vmmov 0   ;;  %s1040_s1 = inlined_call_operand.vmem [shape: f32[3,128], index: 1, kind: input, shape index: {}]   ;;  %s1041_s0 = inlined_call_operand.vmem [shape: f32[128,3], index: 0, kind: input, shape index: {}]   ;;  %s1042_s3 = inlined_call_operand.vmem [shape: f32[128,128], index: 3, kind: input, shape index: {}]   ;;  %s1043_s2 = inlined_call_operand.vmem [shape: f32[1,128], index: 2, kind: input, shape index: {}]   ;;  %s1044_s7 = inlined_call_operand.vmem [shape: f32[8,1], index: 7, kind: input, shape index: {}]   ;;  %s1045_s6 = inlined_call_operand.vmem [shape: f32[8,1], index: 6, kind: input, shape index: {}]   ;;  %s1046_s4 = inlined_call_operand.vmem [shape: f32[1,128], index: 4, kind: input, shape index: {}]   ;;  %s1047_s5 = inlined_call_operand.vmem [shape: f32[8,128], index: 5, kind: input, shape index: {}]   ;;  %s1048_s8 = inlined_call_operand.vmem [shape: f32[8,128], index: 8, kind: output, shape index: {}]  }
   0x1   :  { %v45_v0 = vld [vmem:[%s1040_s1] sm:$0x7]  ;;  %v30_v2 = vld [vmem:[%s1041_s0 + $0x8] sm:$0xff]  ;;  %v31_v3 = vld [vmem:[%s1041_s0 + $0x10] sm:$0xff] }
   0x2   :  { %v29_v1 = vld [vmem:[%s1041_s0] sm:$0xff]  ;;  %627 = vmatprep.subr.msk.mxu1 %vm102_vm0, %v45_v0  ;;  %v32_v4 = vld [vmem:[%s1041_s0 + $0x18] sm:$0xff]  ;;  %v281_v7 = vld [vmem:[%s1042_s3 + $0x70] sm:$0xff] }
   0x3   :  { %629 = vmatprep.mubr.msk.f32.mxu1 %vm53_vm1, %v29_v1  ;;  %628 = vmatpush3.msk.msra.mxu1 %vm102_vm0, %v45_v0  ;;  %v33_v5 = vld [vmem:[%s1041_s0 + $0x20] sm:$0xff]  ;;  %v282_v6 = vld [vmem:[%s1042_s3 + $0x78] sm:$0xff]  ;;  %v34_v8 = vld [vmem:[%s1041_s0 + $0x28] sm:$0xff] }
   0x4   :  { %630 = vmatmul.mubr.msk.f32.vlgmr.msra.gmra.mxu1 %vm53_vm1, %v30_v2  ;;  %653 = vmatprep.subr.mxu1 %v282_v6  ;;  %v280_v9 = vld [vmem:[%s1042_s3 + $0x68] sm:$0xff]  ;;  %v35_v10 = vld [vmem:[%s1041_s0 + $0x30] sm:$0xff]  ;;  %v279_v11 = vld [vmem:[%s1042_s3 + $0x60] sm:$0xff] }
   0x5   :  { %632 = vmatprep.mubr.msk.f32.mxu1 %vm53_vm1, %v31_v3  ;;  %654 = vmatpush3.msra.mxu1 %v282_v6  ;;  %v36_v12 = vld [vmem:[%s1041_s0 + $0x38] sm:$0xff]  ;;  %v37_v14 = vld [vmem:[%s1041_s0 + $0x40] sm:$0xff]  ;;  %v277_v15 = vld [vmem:[%s1042_s3 + $0x50] sm:$0xff] }
   0x6   :  { %655 = vmatprep.subr.mxu1 %v281_v7  ;;  %v278_v13 = vld [vmem:[%s1042_s3 + $0x58] sm:$0xff]  ;;  %v38_v16 = vld [vmem:[%s1041_s0 + $0x48] sm:$0xff]  ;;  %v39_v18 = vld [vmem:[%s1041_s0 + $0x50] sm:$0xff] }
   0x7   :  { %656 = vmatpush3.msra.mxu1 %v281_v7  ;;  %v276_v17 = vld [vmem:[%s1042_s3 + $0x48] sm:$0xff]  ;;  %v40_v19 = vld [vmem:[%s1041_s0 + $0x58] sm:$0xff]  ;;  %v41_v20 = vld [vmem:[%s1041_s0 + $0x60] sm:$0xff] }
   0x8   :  { %633 = vmatmul.mubr.msk.f32.gmra.mxu1 %vm53_vm1, %v32_v4  ;;  %657 = vmatprep.subr.mxu1 %v280_v9  ;;  %v42_v21 = vld [vmem:[%s1041_s0 + $0x68] sm:$0xff]  ;;  %v43_v22 = vld [vmem:[%s1041_s0 + $0x70] sm:$0xff]  ;;  %v44_v23 = vld [vmem:[%s1041_s0 + $0x78] sm:$0xff] }
   0x9   :  { %635 = vmatprep.mubr.msk.f32.mxu1 %vm53_vm1, %v33_v5  ;;  %658 = vmatpush3.msra.mxu1 %v280_v9  ;;  %v275_v24 = vld [vmem:[%s1042_s3 + $0x40] sm:$0xff]  ;;  %v274_v25 = vld [vmem:[%s1042_s3 + $0x38] sm:$0xff]  ;;  %v273_v26 = vld [vmem:[%s1042_s3 + $0x30] sm:$0xff] }
   0xa   :  { %659 = vmatprep.subr.mxu1 %v279_v11  ;;  %v272_v27 = vld [vmem:[%s1042_s3 + $0x28] sm:$0xff]  ;;  %v271_v28 = vld [vmem:[%s1042_s3 + $0x20] sm:$0xff]  ;;  %v270_v29 = vld [vmem:[%s1042_s3 + $0x18] sm:$0xff] }
   0xb   :  { %660 = vmatpush3.msra.mxu1 %v279_v11  ;;  %v269_v30 = vld [vmem:[%s1042_s3 + $0x10] sm:$0xff]  ;;  %v268_v31 = vld [vmem:[%s1042_s3 + $0x8] sm:$0xff]  ;;  %v267_v32 = vld [vmem:[%s1042_s3] sm:$0xff] }
   0xc   :  { %636 = vmatmul.mubr.msk.f32.gmra.mxu1 %vm53_vm1, %v34_v8  ;;  %661 = vmatprep.subr.mxu1 %v278_v13  ;;  %v542_v33 = vld [vmem:[%s1043_s2] ss:$0 sm:$0xff] }
   0xd   :  { %638 = vmatprep.mubr.msk.f32.mxu1 %vm53_vm1, %v35_v10  ;;  %662 = vmatpush3.msra.mxu1 %v278_v13 }
   0xe   :  { %663 = vmatprep.subr.mxu1 %v277_v15 }
   0xf   :  { %664 = vmatpush3.msra.mxu1 %v277_v15 }
  0x10   :  { %639 = vmatmul.mubr.msk.f32.gmra.mxu1 %vm53_vm1, %v36_v12  ;;  %665 = vmatprep.subr.mxu1 %v276_v17 }
  0x11   :  { %641 = vmatprep.mubr.msk.f32.mxu1 %vm53_vm1, %v37_v14  ;;  %666 = vmatpush3.msra.mxu1 %v276_v17 }
  0x12   :  { %667 = vmatprep.subr.mxu1 %v275_v24 }
  0x13   :  { %668 = vmatpush3.msra.mxu1 %v275_v24 }
  0x14   :  { %642 = vmatmul.mubr.msk.f32.gmra.mxu1 %vm53_vm1, %v38_v16  ;;  %669 = vmatprep.subr.mxu1 %v274_v25 }
  0x15   :  { %644 = vmatprep.mubr.msk.f32.mxu1 %vm53_vm1, %v39_v18  ;;  %670 = vmatpush3.msra.mxu1 %v274_v25  ;;  %v812_v18 = vmov 0.0  }
  0x16   :  { %671 = vmatprep.subr.mxu1 %v273_v26  ;;  %709 = vmatprep.subr.mxu0 %v812_v18 }
  0x17   :  { %672 = vmatpush3.msra.mxu1 %v273_v26  ;;  %741 = vmatprep.mubr.msk.f32.mxu0 %vm813_vm2, %v812_v18 }
  0x18   :  { %645 = vmatmul.mubr.msk.f32.gmra.mxu1 %vm53_vm1, %v40_v19  ;;  %673 = vmatprep.subr.mxu1 %v272_v27  ;;  %v814_v19 = vmov 0  }
  0x19   :  { %647 = vmatprep.mubr.msk.f32.mxu1 %vm53_vm1, %v41_v20  ;;  %674 = vmatpush3.msra.mxu1 %v272_v27  ;;  %v528_v20 = vld [vmem:[%s1044_s7] sm:$0xff] }
  0x1a   :  { %675 = vmatprep.subr.mxu1 %v271_v28  ;;  %747 = vset.pattern.permute.xlu0 %v814_v19  ;;  %vm529_vm3 = vcmp.ne.f32.partialorder %v528_v20, 0.0 }
  0x1b   :  { %676 = vmatpush3.msra.mxu1 %v271_v28 }
  0x1c   :  { %648 = vmatmul.mubr.msk.f32.gmra.mxu1 %vm53_vm1, %v42_v21  ;;  %677 = vmatprep.subr.mxu1 %v270_v29  ;;  %v452_v21 = vld [vmem:[%s1045_s6] sm:$0xff] }
  0x1d   :  { %650 = vmatprep.mubr.msk.f32.mxu1 %vm53_vm1, %v43_v22  ;;  %678 = vmatpush3.msra.mxu1 %v270_v29  ;;  %v531_v22 = vsel %vm529_vm3, 1, %v814_v19 }
  0x1e   :  { %679 = vmatprep.subr.mxu1 %v269_v30  ;;  %455 = vperm.xlu0 %747, %v452_v21  }
  0x1f   :  { %680 = vmatpush3.msra.mxu1 %v269_v30 }
  0x20   :  { %651 = vmatmul.mubr.msk.f32.gmra.mxu1 %vm53_vm1, %v44_v23  ;;  %681 = vmatprep.subr.mxu1 %v268_v31 }
  0x21   :  { %682 = vmatpush3.msra.mxu1 %v268_v31 }
  0x22   :  { %683 = vmatprep.subr.mxu1 %v267_v32  ;;  %533 = vperm.xlu0 %747, %v531_v22  }
  0x23   :  { %684 = vmatpush3.msra.mxu1 %v267_v32 }
  0xc4   :  { %v631_v34 = vpop.f32.mrf.mxu1 }
  0xc5   :  { %v178_v35 = vadd.f32 %v631_v34, %v542_v33 }
  0xc6   :  { %v172_v36 = vpop.f32.mrf.mxu1 }
  0xc7   :  { %v173_v37 = vadd.f32 %v542_v33, %v172_v36 }
  0xc8   :  { %v634_v38 = vpop.f32.mrf.mxu1 }
  0xc9   :  { %748 = vtanh.f32 %v173_v37  ;;  %v188_v39 = vadd.f32 %v634_v38, %v542_v33  ;;  %v997_v37 = vld [vmem:[%s1046_s4] ss:$0 sm:$0xff] }
  0xca   :  { %750 = vtanh.f32 %v178_v35  ;;  %v182_v40 = vpop.f32.mrf.mxu1 }
  0xcb   :  { %v183_v41 = vadd.f32 %v542_v33, %v182_v40 }
  0xcc   :  { %v637_v42 = vpop.f32.mrf.mxu1 }
  0xcd   :  { %752 = vtanh.f32 %v183_v41  ;;  %v198_v43 = vadd.f32 %v637_v42, %v542_v33 }
  0xce   :  { %754 = vtanh.f32 %v188_v39  ;;  %v192_v44 = vpop.f32.mrf.mxu1 }
  0xcf   :  { %v193_v45 = vadd.f32 %v542_v33, %v192_v44 }
  0xd0   :  { %v640_v46 = vpop.f32.mrf.mxu1 }
  0xd1   :  { %756 = vtanh.f32 %v193_v45  ;;  %v208_v47 = vadd.f32 %v640_v46, %v542_v33 }
  0xd2   :  { %758 = vtanh.f32 %v198_v43  ;;  %v202_v48 = vpop.f32.mrf.mxu1 }
  0xd3   :  { %v203_v49 = vadd.f32 %v542_v33, %v202_v48 }
  0xd4   :  { %v643_v50 = vpop.f32.mrf.mxu1 }
  0xd5   :  { %760 = vtanh.f32 %v203_v49  ;;  %v218_v52 = vadd.f32 %v643_v50, %v542_v33 }
  0xd6   :  { %v749_v51 = vpop.eup %748  ;;  %762 = vtanh.f32 %v208_v47  ;;  %v212_v53 = vpop.f32.mrf.mxu1 }
  0xd7   :  { %v751_v54 = vpop.eup %750  ;;  %v213_v55 = vadd.f32 %v542_v33, %v212_v53  ;;  %685 = vmatprep.mubr.f32.mxu1 %v749_v51 }
  0xd8   :  { %v646_v56 = vpop.f32.mrf.mxu1  ;;  %686 = vmatmul.mubr.f32.vlgmr.msra.gmra.mxu1 %v751_v54 }
  0xd9   :  { %764 = vtanh.f32 %v213_v55  ;;  %v228_v58 = vadd.f32 %v646_v56, %v542_v33 }
  0xda   :  { %v753_v57 = vpop.eup %752  ;;  %766 = vtanh.f32 %v218_v52  ;;  %v222_v59 = vpop.f32.mrf.mxu1 }
  0xdb   :  { %v755_v60 = vpop.eup %754  ;;  %v223_v61 = vadd.f32 %v542_v33, %v222_v59  ;;  %688 = vmatprep.mubr.f32.mxu1 %v753_v57 }
  0xdc   :  { %v649_v62 = vpop.f32.mrf.mxu1  ;;  %689 = vmatmul.mubr.f32.gmra.mxu1 %v755_v60 }
  0xdd   :  { %768 = vtanh.f32 %v223_v61  ;;  %v238_v0 = vadd.f32 %v649_v62, %v542_v33 }
  0xde   :  { %v757_v63 = vpop.eup %756  ;;  %770 = vtanh.f32 %v228_v58  ;;  %v232_v1 = vpop.f32.mrf.mxu1 }
  0xdf   :  { %v759_v2 = vpop.eup %758  ;;  %v233_v3 = vadd.f32 %v542_v33, %v232_v1  ;;  %691 = vmatprep.mubr.f32.mxu1 %v757_v63 }
  0xe0   :  { %v652_v4 = vpop.f32.mrf.mxu1  ;;  %692 = vmatmul.mubr.f32.gmra.mxu1 %v759_v2 }
  0xe1   :  { %772 = vtanh.f32 %v233_v3  ;;  %v248_v6 = vadd.f32 %v652_v4, %v542_v33 }
  0xe2   :  { %v761_v5 = vpop.eup %760  ;;  %774 = vtanh.f32 %v238_v0  ;;  %v242_v7 = vpop.f32.mrf.mxu1 }
  0xe3   :  { %v763_v8 = vpop.eup %762  ;;  %v243_v9 = vadd.f32 %v542_v33, %v242_v7  ;;  %694 = vmatprep.mubr.f32.mxu1 %v761_v5 }
  0xe4   :  { %695 = vmatmul.mubr.f32.gmra.mxu1 %v763_v8  ;;  %v451_v8 = vld [vmem:[%s1047_s5] sm:$0xff] }
  0xe5   :  { %776 = vtanh.f32 %v243_v9  ;;  %v456_v9 = vpop.permute.xlu0 %455 }
  0xe6   :  { %v765_v10 = vpop.eup %764  ;;  %778 = vtanh.f32 %v248_v6 }
  0xe7   :  { %v767_v11 = vpop.eup %766  ;;  %697 = vmatprep.mubr.f32.mxu1 %v765_v10 }
  0xe8   :  { %698 = vmatmul.mubr.f32.gmra.mxu1 %v767_v11 }
  0xe9   :  { %v534_v11 = vpop.permute.xlu0 %533 }
  0xea   :  { %v769_v12 = vpop.eup %768  ;;  %vm535_vm4 = vcmp.eq.s32.totalorder %v534_v11, 1 }
  0xeb   :  { %v771_v13 = vpop.eup %770  ;;  %700 = vmatprep.mubr.f32.mxu1 %v769_v12 }
  0xec   :  { %701 = vmatmul.mubr.f32.gmra.mxu1 %v771_v13 }
  0xee   :  { %v773_v14 = vpop.eup %772 }
  0xef   :  { %v775_v15 = vpop.eup %774  ;;  %703 = vmatprep.mubr.f32.mxu1 %v773_v14 }
  0xf0   :  { %704 = vmatmul.mubr.f32.gmra.mxu1 %v775_v15 }
  0xf2   :  { %v777_v16 = vpop.eup %776 }
  0xf3   :  { %v779_v17 = vpop.eup %778  ;;  %706 = vmatprep.mubr.f32.mxu1 %v777_v16 }
  0xf4   :  { %707 = vmatmul.mubr.f32.gmra.mxu1 %v779_v17 }
 0x198   :  { %v986_v23 = vpop.f32.mrf.mxu1 }
 0x199   :  { %v362_v0 = vadd.f32 %v986_v23, %v997_v37 }
 0x19a   :  { %v988_v24 = vpop.f32.mrf.mxu1 }
 0x19b   :  { %v357_v2 = vadd.f32 %v997_v37, %v988_v24 }
 0x19c   :  { %v990_v25 = vpop.f32.mrf.mxu1 }
 0x19d   :  { %v372_v60 = vadd.f32 %v990_v25, %v997_v37 }
 0x19e   :  { %v992_v26 = vpop.f32.mrf.mxu1 }
 0x19f   :  { %v367_v62 = vadd.f32 %v997_v37, %v992_v26 }
 0x1a0   :  { %v693_v27 = vpop.f32.mrf.mxu1 }
 0x1a1   :  { %v382_v56 = vadd.f32 %v693_v27, %v997_v37 }
 0x1a2   :  { %v376_v28 = vpop.f32.mrf.mxu1 }
 0x1a3   :  { %v377_v58 = vadd.f32 %v997_v37, %v376_v28 }
 0x1a4   :  { %v696_v29 = vpop.f32.mrf.mxu1 }
 0x1a5   :  { %v392_v52 = vadd.f32 %v696_v29, %v997_v37 }
 0x1a6   :  { %v386_v30 = vpop.f32.mrf.mxu1 }
 0x1a7   :  { %v387_v54 = vadd.f32 %v997_v37, %v386_v30 }
 0x1a8   :  { %v699_v31 = vpop.f32.mrf.mxu1 }
 0x1a9   :  { %v402_v48 = vadd.f32 %v699_v31, %v997_v37 }
 0x1aa   :  { %v396_v32 = vpop.f32.mrf.mxu1 }
 0x1ab   :  { %v397_v50 = vadd.f32 %v997_v37, %v396_v32 }
 0x1ac   :  { %v702_v33 = vpop.f32.mrf.mxu1 }
 0x1ad   :  { %v412_v44 = vadd.f32 %v702_v33, %v997_v37 }
 0x1ae   :  { %v406_v34 = vpop.f32.mrf.mxu1 }
 0x1af   :  { %v407_v46 = vadd.f32 %v997_v37, %v406_v34 }
 0x1b0   :  { %v705_v35 = vpop.f32.mrf.mxu1 }
 0x1b1   :  { %v422_v42 = vadd.f32 %v705_v35, %v997_v37 }
 0x1b2   :  { %v416_v36 = vpop.f32.mrf.mxu1 }
 0x1b3   :  { %v417_v43 = vadd.f32 %v997_v37, %v416_v36 }
 0x1b4   :  { %v708_v38 = vpop.f32.mrf.mxu1 }
 0x1b5   :  { %v432_v39 = vadd.f32 %v708_v38, %v997_v37 }
 0x1b6   :  { %v426_v40 = vpop.f32.mrf.mxu1 }
 0x1b7   :  { %780 = vtanh.f32 %v432_v39  ;;  %v427_v41 = vadd.f32 %v997_v37, %v426_v40 }
 0x1b9   :  { %782 = vtanh.f32 %v427_v41 }
 0x1ba   :  { %784 = vtanh.f32 %v422_v42 }
 0x1bb   :  { %786 = vtanh.f32 %v417_v43 }
 0x1bc   :  { %788 = vtanh.f32 %v412_v44 }
 0x1bd   :  { %790 = vtanh.f32 %v407_v46 }
 0x1be   :  { %792 = vtanh.f32 %v402_v48 }
 0x1bf   :  { %794 = vtanh.f32 %v397_v50 }
 0x1c0   :  { %796 = vtanh.f32 %v392_v52 }
 0x1c1   :  { %798 = vtanh.f32 %v387_v54 }
 0x1c2   :  { %800 = vtanh.f32 %v382_v56 }
 0x1c3   :  { %802 = vtanh.f32 %v377_v58 }
 0x1c4   :  { %v781_v45 = vpop.eup %780  ;;  %804 = vtanh.f32 %v372_v60 }
 0x1c5   :  { %710 = vmatpush3.xpose.msra.mxu0 %v781_v45  ;;  %806 = vtanh.f32 %v367_v62 }
 0x1c6   :  { %711 = vmatprep.subr.mxu0 %v812_v18  ;;  %v783_v47 = vpop.eup %782  ;;  %808 = vtanh.f32 %v362_v0 }
 0x1c7   :  { %v785_v49 = vpop.eup %784  ;;  %810 = vtanh.f32 %v357_v2 }
 0x1c8   :  { %v787_v51 = vpop.eup %786 }
 0x1c9   :  { %712 = vmatpush3.xpose.msra.mxu0 %v783_v47  ;;  %v789_v53 = vpop.eup %788 }
 0x1ca   :  { %713 = vmatprep.subr.mxu0 %v812_v18  ;;  %v791_v55 = vpop.eup %790 }
 0x1cb   :  { %v793_v57 = vpop.eup %792 }
 0x1cc   :  { %v795_v59 = vpop.eup %794 }
 0x1cd   :  { %714 = vmatpush3.xpose.msra.mxu0 %v785_v49  ;;  %v797_v61 = vpop.eup %796 }
 0x1ce   :  { %715 = vmatprep.subr.mxu0 %v812_v18  ;;  %v799_v63 = vpop.eup %798 }
 0x1cf   :  { %v801_v1 = vpop.eup %800 }
 0x1d0   :  { %v803_v3 = vpop.eup %802 }
 0x1d1   :  { %716 = vmatpush3.xpose.msra.mxu0 %v787_v51  ;;  %v805_v4 = vpop.eup %804 }
 0x1d2   :  { %717 = vmatprep.subr.mxu0 %v812_v18  ;;  %v807_v5 = vpop.eup %806 }
 0x1d3   :  { %v809_v6 = vpop.eup %808 }
 0x1d4   :  { %v811_v7 = vpop.eup %810 }
 0x1d5   :  { %718 = vmatpush3.xpose.msra.mxu0 %v789_v53 }
 0x1d6   :  { %719 = vmatprep.subr.mxu0 %v812_v18 }
 0x1d9   :  { %720 = vmatpush3.xpose.msra.mxu0 %v791_v55 }
 0x1da   :  { %721 = vmatprep.subr.mxu0 %v812_v18 }
 0x1dd   :  { %722 = vmatpush3.xpose.msra.mxu0 %v793_v57 }
 0x1de   :  { %723 = vmatprep.subr.mxu0 %v812_v18 }
 0x1e1   :  { %724 = vmatpush3.xpose.msra.mxu0 %v795_v59 }
 0x1e2   :  { %725 = vmatprep.subr.mxu0 %v812_v18 }
 0x1e5   :  { %726 = vmatpush3.xpose.msra.mxu0 %v797_v61 }
 0x1e6   :  { %727 = vmatprep.subr.mxu0 %v812_v18 }
 0x1e9   :  { %728 = vmatpush3.xpose.msra.mxu0 %v799_v63 }
 0x1ea   :  { %729 = vmatprep.subr.mxu0 %v812_v18 }
 0x1ed   :  { %730 = vmatpush3.xpose.msra.mxu0 %v801_v1 }
 0x1ee   :  { %731 = vmatprep.subr.mxu0 %v812_v18 }
 0x1f1   :  { %732 = vmatpush3.xpose.msra.mxu0 %v803_v3 }
 0x1f2   :  { %733 = vmatprep.subr.mxu0 %v812_v18 }
 0x1f5   :  { %734 = vmatpush3.xpose.msra.mxu0 %v805_v4 }
 0x1f6   :  { %735 = vmatprep.subr.mxu0 %v812_v18 }
 0x1f9   :  { %736 = vmatpush3.xpose.msra.mxu0 %v807_v5 }
 0x1fa   :  { %737 = vmatprep.subr.mxu0 %v812_v18 }
 0x1fd   :  { %738 = vmatpush3.xpose.msra.mxu0 %v809_v6 }
 0x1fe   :  { %739 = vmatprep.subr.mxu0 %v812_v18 }
 0x201   :  { %740 = vmatpush3.xpose.msra.mxu0 %v811_v7 }
 0x204   :  { %742 = vmatmul.mubr.f32.vlgmr.msra.gmra.mxu0 %v451_v8 }
 0x2c4   :  { %v524_v10 = vpop.f32.mrf.mxu0 }
 0x2c5   :  { %v525_v12 = vadd.f32 %v524_v10, %v456_v9 }
 0x2c6   :  { %v743_v13 = vpop.f32.mrf.mxu0 }
 0x2c7   :  { %v530_v14 = vand.u32 2147483647, %v525_v12 }
 0x2c9   :  { %v536_v15 = vsel %vm535_vm4, %v530_v14, %v525_v12 }
 0x2ca   :  { %537 = vst [vmem:[%s1048_s8] sm:$0xff] %v536_v15 }

</bundles_post_ra>
